<compile_context>
chip_gen: v7x
topology: tpu7x:2x2x1
jax: 0.10.0
libtpu: 0.0.40
codegen_flags: <defaults>
</compile_context>

<pallas_src>
import math

import jax
import jax.numpy as jnp
from jax import lax
from jax.experimental import pallas as pl
from jax.experimental.pallas import tpu as pltpu


def _make_attention_kernel(T: int, C: int, n_head: int):
    """Kernel closure over the static problem sizes (one batch element/step)."""
    D = C // n_head
    scale = 1.0 / math.sqrt(D)

    def kernel(x_ref, xt_ref, w_ref, b_ref, o_ref):
        # x_ref  : (1, T, C)  tokens on sublanes  (natural layout, for q)
        # xt_ref : (1, C, T)  tokens on lanes     (transposed layout, for k/v)
        # w_ref  : (4C, C)    rows [0:C]=c_attn.q^T, [C:3C]=c_attn.kv, [3C:4C]=c_proj^T
        # b_ref  : (4, C)     rows = q / k / v / proj biases
        x = x_ref[0]                                     # (T, C)
        x_t = xt_ref[0]                                  # (C, T)
        W = w_ref[...]
        b = b_ref[...]

        # ---- q projection: (T, C), tokens on sublanes, heads/channels on lanes
        if C <= 16:
            q = b[0:1, :]
            for c in range(C):
                q = q + x[:, c:c + 1] * W[c:c + 1, :]    # rank-1 VPU accumulation
        else:
            q = jnp.dot(x, W[0:C, :], preferred_element_type=jnp.float32) + b[0:1, :]
        if scale != 1.0:
            q = q * scale                                # softmax scale folded into q

        # ---- k/v projection: (2C, T), tokens on lanes (bias added per head below)
        if C <= 16:
            kv_t = W[C:3 * C, 0:1] * x_t[0:1, :]
            for c in range(1, C):
                kv_t = kv_t + W[C:3 * C, c:c + 1] * x_t[c:c + 1, :]
        else:
            kv_t = jnp.dot(W[C:3 * C, :], x_t, preferred_element_type=jnp.float32)

        # ---- per-batch causal mask: plain row >= col (no // or %)
        row = lax.broadcasted_iota(jnp.int32, (T, T), 0)
        col = lax.broadcasted_iota(jnp.int32, (T, T), 1)
        causal = row >= col

        # ---- per-head attention; head outputs fused directly into c_proj sum
        acc = b[3:4, :]                                  # c_proj bias, broadcasts on first add
        for h in range(n_head):
            lo, hi = h * D, (h + 1) * D
            if D == 1:
                # Outer-product scores on the VPU (keys on lanes), no MXU.
                k_row = kv_t[lo:hi, :] + b[1:2, lo:hi]           # (1, T)
                v_row = kv_t[C + lo:C + hi, :] + b[2:3, lo:hi]   # (1, T)
                s = q[:, lo:hi] * k_row                          # (T, T)
            else:
                # D > 1 fallback (not exercised here): k already (D, T) -> no k.T.
                q_h = q[:, lo:hi]                                # (T, D)
                s = jnp.dot(q_h, kv_t[lo:hi, :],
                            preferred_element_type=jnp.float32)  # (T, T)
                # fold in k bias: q_h . bk_h, lane reduce (q already scaled)
                s = s + jnp.sum(q_h * b[1:2, lo:hi], axis=-1, keepdims=True)

            s = jnp.where(causal, s, jnp.float32(-1e9))
            m = jnp.max(s, axis=-1, keepdims=True)               # lane-axis reduce
            e = jnp.exp(s - m)
            denom = jnp.sum(e, axis=-1, keepdims=True)
            att = e * pl.reciprocal(denom, approx=False)         # exact: 1e-5 tol

            if D == 1:
                y_h = jnp.sum(att * v_row, axis=-1, keepdims=True)        # (T, 1)
                acc = acc + y_h * W[3 * C + lo:3 * C + hi, :]             # (T,1)*(1,C)
            else:
                y_h = lax.dot_general(att, kv_t[C + lo:C + hi, :],
                                      (((1,), (1,)), ((), ())),
                                      preferred_element_type=jnp.float32)  # (T, D)
                y_h = y_h + b[2:3, lo:hi]           # v bias (att rows sum to 1)
                acc = acc + jnp.dot(y_h, W[3 * C + lo:3 * C + hi, :],
                                    preferred_element_type=jnp.float32)

        o_ref[0] = acc.astype(o_ref.dtype)

    return kernel


def causal_self_attention(x, w_attn, b_attn, w_proj, b_proj, *, n_head):
    """x: (B, T, C) float32 -> (B, T, C) float32."""
    B, T, C = x.shape

    # Host-side layout prep (no in-kernel transposes):
    #  * x passed in both natural (B,T,C) and transposed (B,C,T) layouts.
    #  * all parameters packed into two dense blocks -> 4 small DMAs total.
    x_t = jnp.transpose(x, (0, 2, 1))                            # (B, C, T)
    w_all = jnp.concatenate([w_attn[:C, :].T,                    # q weights, (in, out)
                             w_attn[C:, :],                      # k,v weights, (out, in)
                             w_proj.T], axis=0)                  # proj weights, (in, out)
    b_all = jnp.concatenate([b_attn.reshape(3, C),
                             b_proj.reshape(1, C)], axis=0)      # rows: q, k, v, proj

    kernel = _make_attention_kernel(T, C, n_head)

    out = pl.pallas_call(
        kernel,
        out_shape=jax.ShapeDtypeStruct((B, T, C), jnp.float32),
        grid_spec=pltpu.PrefetchScalarGridSpec(
            num_scalar_prefetch=0,
            grid=(B,),                                           # batches are independent
            in_specs=[
                pl.BlockSpec((1, T, C), lambda bi: (bi, 0, 0)),  # x
                pl.BlockSpec((1, C, T), lambda bi: (bi, 0, 0)),  # x (transposed)
                pl.BlockSpec((4 * C, C), lambda bi: (0, 0)),     # packed weights (resident)
                pl.BlockSpec((4, C), lambda bi: (0, 0)),         # packed biases (resident)
            ],
            out_specs=pl.BlockSpec((1, T, C), lambda bi: (bi, 0, 0)),
        ),
        compiler_params=pltpu.CompilerParams(
            dimension_semantics=("parallel",)),
    )(x, x_t, w_all, b_all)

    return out


def causal_self_attention_ref(x, w_attn, b_attn, w_proj, b_proj, *, n_head):
    """Pure-JAX reference mirroring the PyTorch forward (dropout=0)."""
    B, T, C = x.shape
    D = C // n_head
    qkv = jnp.einsum("btc,oc->bto", x, w_attn) + b_attn
    q, k, v = jnp.split(qkv, 3, axis=2)
    q = q.reshape(B, T, n_head, D).transpose(0, 2, 1, 3)
    k = k.reshape(B, T, n_head, D).transpose(0, 2, 1, 3)
    v = v.reshape(B, T, n_head, D).transpose(0, 2, 1, 3)
    att = jnp.einsum("bhtd,bhsd->bhts", q, k) * (1.0 / math.sqrt(D))
    mask = jnp.tril(jnp.ones((T, T), dtype=bool))
    att = jnp.where(mask[None, None], att, -1e9)
    att = jax.nn.softmax(att, axis=-1)
    y = jnp.einsum("bhts,bhsd->bhtd", att, v)
    y = y.transpose(0, 2, 1, 3).reshape(B, T, C)
    return jnp.einsum("btc,oc->bto", y, w_proj) + b_proj


if __name__ == "__main__":
    # config(): n_embd=3, n_head=3, bias=1, dropout=0, block_size=40
    n_embd = 3
    n_head = 3
    B, T = 2, 8  # T <= block_size

    key = jax.random.PRNGKey(0)
    kx, kw1, kb1, kw2, kb2 = jax.random.split(key, 5)

    # deterministic parameter init (nn.Linear-style uniform(-1/sqrt(fan_in), ..))
    bound = 1.0 / math.sqrt(n_embd)
    w_attn = jax.random.uniform(kw1, (3 * n_embd, n_embd), jnp.float32, -bound, bound)
    b_attn = jax.random.uniform(kb1, (3 * n_embd,), jnp.float32, -bound, bound)
    w_proj = jax.random.uniform(kw2, (n_embd, n_embd), jnp.float32, -bound, bound)
    b_proj = jax.random.uniform(kb2, (n_embd,), jnp.float32, -bound, bound)

    x = jax.random.normal(kx, (B, T, n_embd), jnp.float32)

    y = causal_self_attention(x, w_attn, b_attn, w_proj, b_proj, n_head=n_head)
    y = jax.block_until_ready(y)

    y_ref = causal_self_attention_ref(x, w_attn, b_attn, w_proj, b_proj, n_head=n_head)
    assert y.shape == (B, T, n_embd)
    assert jnp.allclose(y, y_ref, atol=1e-5, rtol=1e-5), "mismatch vs reference"

    print("KERNEL_OK")
</pallas_src>

<mosaic_0001>
module attributes {stable_mosaic.version = 11 : i64} {
  func.func @kernel(%arg0: i32, %arg1: memref<1x8x3xf32, #tpu.memory_space<vmem>>, %arg2: memref<1x3x8xf32, #tpu.memory_space<vmem>>, %arg3: memref<12x3xf32, #tpu.memory_space<vmem>>, %arg4: memref<4x3xf32, #tpu.memory_space<vmem>>, %arg5: memref<1x8x3xf32, #tpu.memory_space<vmem>>) attributes {dimension_semantics = [#tpu.dimension_semantics<parallel>], iteration_bounds = array<i64: 2>, scalar_prefetch = 0 : i64, scratch_operands = 0 : i64, tpu.core_type = #tpu.core_type<tc>, window_params = [{transform_indices = @transform_0, window_bounds = array<i64: 1, 8, 3>}, {transform_indices = @transform_1, window_bounds = array<i64: 1, 3, 8>}, {pipeline_mode = #tpu.pipeline_mode<synchronous>, transform_indices = @transform_2, window_bounds = array<i64: 12, 3>}, {pipeline_mode = #tpu.pipeline_mode<synchronous>, transform_indices = @transform_3, window_bounds = array<i64: 4, 3>}, {transform_indices = @transform_4, window_bounds = array<i64: 1, 8, 3>}]} {
    %c0 = arith.constant 0 : index
    %c0_0 = arith.constant 0 : index
    %c0_1 = arith.constant 0 : index
    %0 = vector.load %arg1[%c0, %c0_0, %c0_1] : memref<1x8x3xf32, #tpu.memory_space<vmem>>, vector<1x8x3xf32>
    %1 = vector.shape_cast %0 : vector<1x8x3xf32> to vector<8x3xf32>
    %c0_2 = arith.constant 0 : index
    %c0_3 = arith.constant 0 : index
    %c0_4 = arith.constant 0 : index
    %2 = vector.load %arg2[%c0_2, %c0_3, %c0_4] : memref<1x3x8xf32, #tpu.memory_space<vmem>>, vector<1x3x8xf32>
    %3 = vector.shape_cast %2 : vector<1x3x8xf32> to vector<3x8xf32>
    %c0_5 = arith.constant 0 : index
    %c0_6 = arith.constant 0 : index
    %4 = vector.load %arg3[%c0_5, %c0_6] : memref<12x3xf32, #tpu.memory_space<vmem>>, vector<12x3xf32>
    %c0_7 = arith.constant 0 : index
    %c0_8 = arith.constant 0 : index
    %5 = vector.load %arg4[%c0_7, %c0_8] : memref<4x3xf32, #tpu.memory_space<vmem>>, vector<4x3xf32>
    %6 = vector.extract_strided_slice %5 {offsets = [0, 0], sizes = [1, 3], strides = [1, 1]} : vector<4x3xf32> to vector<1x3xf32>
    %7 = vector.extract_strided_slice %1 {offsets = [0, 0], sizes = [8, 1], strides = [1, 1]} : vector<8x3xf32> to vector<8x1xf32>
    %8 = vector.extract_strided_slice %4 {offsets = [0, 0], sizes = [1, 3], strides = [1, 1]} : vector<12x3xf32> to vector<1x3xf32>
    %9 = vector.broadcast %7 : vector<8x1xf32> to vector<8x3xf32>
    %10 = vector.broadcast %8 : vector<1x3xf32> to vector<8x3xf32>
    %11 = arith.mulf %9, %10 : vector<8x3xf32>
    %12 = vector.broadcast %6 : vector<1x3xf32> to vector<8x3xf32>
    %13 = arith.addf %12, %11 : vector<8x3xf32>
    %14 = vector.extract_strided_slice %1 {offsets = [0, 1], sizes = [8, 1], strides = [1, 1]} : vector<8x3xf32> to vector<8x1xf32>
    %15 = vector.extract_strided_slice %4 {offsets = [1, 0], sizes = [1, 3], strides = [1, 1]} : vector<12x3xf32> to vector<1x3xf32>
    %16 = vector.broadcast %14 : vector<8x1xf32> to vector<8x3xf32>
    %17 = vector.broadcast %15 : vector<1x3xf32> to vector<8x3xf32>
    %18 = arith.mulf %16, %17 : vector<8x3xf32>
    %19 = arith.addf %13, %18 : vector<8x3xf32>
    %20 = vector.extract_strided_slice %1 {offsets = [0, 2], sizes = [8, 1], strides = [1, 1]} : vector<8x3xf32> to vector<8x1xf32>
    %21 = vector.extract_strided_slice %4 {offsets = [2, 0], sizes = [1, 3], strides = [1, 1]} : vector<12x3xf32> to vector<1x3xf32>
    %22 = vector.broadcast %20 : vector<8x1xf32> to vector<8x3xf32>
    %23 = vector.broadcast %21 : vector<1x3xf32> to vector<8x3xf32>
    %24 = arith.mulf %22, %23 : vector<8x3xf32>
    %25 = arith.addf %19, %24 : vector<8x3xf32>
    %26 = vector.extract_strided_slice %4 {offsets = [3, 0], sizes = [6, 1], strides = [1, 1]} : vector<12x3xf32> to vector<6x1xf32>
    %27 = vector.extract_strided_slice %3 {offsets = [0, 0], sizes = [1, 8], strides = [1, 1]} : vector<3x8xf32> to vector<1x8xf32>
    %28 = vector.broadcast %26 : vector<6x1xf32> to vector<6x8xf32>
    %29 = vector.broadcast %27 : vector<1x8xf32> to vector<6x8xf32>
    %30 = arith.mulf %28, %29 : vector<6x8xf32>
    %31 = vector.extract_strided_slice %4 {offsets = [3, 1], sizes = [6, 1], strides = [1, 1]} : vector<12x3xf32> to vector<6x1xf32>
    %32 = vector.extract_strided_slice %3 {offsets = [1, 0], sizes = [1, 8], strides = [1, 1]} : vector<3x8xf32> to vector<1x8xf32>
    %33 = vector.broadcast %31 : vector<6x1xf32> to vector<6x8xf32>
    %34 = vector.broadcast %32 : vector<1x8xf32> to vector<6x8xf32>
    %35 = arith.mulf %33, %34 : vector<6x8xf32>
    %36 = arith.addf %30, %35 : vector<6x8xf32>
    %37 = vector.extract_strided_slice %4 {offsets = [3, 2], sizes = [6, 1], strides = [1, 1]} : vector<12x3xf32> to vector<6x1xf32>
    %38 = vector.extract_strided_slice %3 {offsets = [2, 0], sizes = [1, 8], strides = [1, 1]} : vector<3x8xf32> to vector<1x8xf32>
    %39 = vector.broadcast %37 : vector<6x1xf32> to vector<6x8xf32>
    %40 = vector.broadcast %38 : vector<1x8xf32> to vector<6x8xf32>
    %41 = arith.mulf %39, %40 : vector<6x8xf32>
    %42 = arith.addf %36, %41 : vector<6x8xf32>
    %43 = tpu.iota {dimensions = array<i32: 0>} : vector<8x8xi32>
    %44 = tpu.iota {dimensions = array<i32: 1>} : vector<8x8xi32>
    %45 = arith.cmpi sge, %43, %44 : vector<8x8xi32>
    %46 = vector.extract_strided_slice %5 {offsets = [3, 0], sizes = [1, 3], strides = [1, 1]} : vector<4x3xf32> to vector<1x3xf32>
    %47 = vector.extract_strided_slice %42 {offsets = [0, 0], sizes = [1, 8], strides = [1, 1]} : vector<6x8xf32> to vector<1x8xf32>
    %48 = vector.extract_strided_slice %5 {offsets = [1, 0], sizes = [1, 1], strides = [1, 1]} : vector<4x3xf32> to vector<1x1xf32>
    %49 = vector.broadcast %48 : vector<1x1xf32> to vector<1x8xf32>
    %50 = arith.addf %47, %49 : vector<1x8xf32>
    %51 = vector.extract_strided_slice %42 {offsets = [3, 0], sizes = [1, 8], strides = [1, 1]} : vector<6x8xf32> to vector<1x8xf32>
    %52 = vector.extract_strided_slice %5 {offsets = [2, 0], sizes = [1, 1], strides = [1, 1]} : vector<4x3xf32> to vector<1x1xf32>
    %53 = vector.broadcast %52 : vector<1x1xf32> to vector<1x8xf32>
    %54 = arith.addf %51, %53 : vector<1x8xf32>
    %55 = vector.extract_strided_slice %25 {offsets = [0, 0], sizes = [8, 1], strides = [1, 1]} : vector<8x3xf32> to vector<8x1xf32>
    %56 = vector.broadcast %55 : vector<8x1xf32> to vector<8x8xf32>
    %57 = vector.broadcast %50 : vector<1x8xf32> to vector<8x8xf32>
    %58 = arith.mulf %56, %57 : vector<8x8xf32>
    %cst = arith.constant -1.000000e+09 : f32
    %59 = vector.broadcast %cst : f32 to vector<8x8xf32>
    %60 = arith.select %45, %58, %59 : vector<8x8xi1>, vector<8x8xf32>
    %cst_9 = arith.constant dense<0xFF800000> : vector<8xf32>
    %61 = vector.multi_reduction <maximumf>, %60, %cst_9 [1] : vector<8x8xf32> to vector<8xf32>
    %62 = vector.shape_cast %61 : vector<8xf32> to vector<8x1xf32>
    %63 = vector.broadcast %62 : vector<8x1xf32> to vector<8x8xf32>
    %64 = arith.subf %60, %63 : vector<8x8xf32>
    %65 = math.exp %64 : vector<8x8xf32>
    %cst_10 = arith.constant dense<0.000000e+00> : vector<8xf32>
    %66 = vector.multi_reduction <add>, %65, %cst_10 [1] : vector<8x8xf32> to vector<8xf32>
    %67 = vector.shape_cast %66 : vector<8xf32> to vector<8x1xf32>
    %68 = tpu.reciprocal %67 : vector<8x1xf32> -> vector<8x1xf32>
    %69 = vector.broadcast %68 : vector<8x1xf32> to vector<8x8xf32>
    %70 = arith.mulf %65, %69 : vector<8x8xf32>
    %71 = vector.broadcast %54 : vector<1x8xf32> to vector<8x8xf32>
    %72 = arith.mulf %70, %71 : vector<8x8xf32>
    %cst_11 = arith.constant dense<0.000000e+00> : vector<8xf32>
    %73 = vector.multi_reduction <add>, %72, %cst_11 [1] : vector<8x8xf32> to vector<8xf32>
    %74 = vector.shape_cast %73 : vector<8xf32> to vector<8x1xf32>
    %75 = vector.extract_strided_slice %4 {offsets = [9, 0], sizes = [1, 3], strides = [1, 1]} : vector<12x3xf32> to vector<1x3xf32>
    %76 = vector.broadcast %74 : vector<8x1xf32> to vector<8x3xf32>
    %77 = vector.broadcast %75 : vector<1x3xf32> to vector<8x3xf32>
    %78 = arith.mulf %76, %77 : vector<8x3xf32>
    %79 = vector.broadcast %46 : vector<1x3xf32> to vector<8x3xf32>
    %80 = arith.addf %79, %78 : vector<8x3xf32>
    %81 = vector.extract_strided_slice %42 {offsets = [1, 0], sizes = [1, 8], strides = [1, 1]} : vector<6x8xf32> to vector<1x8xf32>
    %82 = vector.extract_strided_slice %5 {offsets = [1, 1], sizes = [1, 1], strides = [1, 1]} : vector<4x3xf32> to vector<1x1xf32>
    %83 = vector.broadcast %82 : vector<1x1xf32> to vector<1x8xf32>
    %84 = arith.addf %81, %83 : vector<1x8xf32>
    %85 = vector.extract_strided_slice %42 {offsets = [4, 0], sizes = [1, 8], strides = [1, 1]} : vector<6x8xf32> to vector<1x8xf32>
    %86 = vector.extract_strided_slice %5 {offsets = [2, 1], sizes = [1, 1], strides = [1, 1]} : vector<4x3xf32> to vector<1x1xf32>
    %87 = vector.broadcast %86 : vector<1x1xf32> to vector<1x8xf32>
    %88 = arith.addf %85, %87 : vector<1x8xf32>
    %89 = vector.extract_strided_slice %25 {offsets = [0, 1], sizes = [8, 1], strides = [1, 1]} : vector<8x3xf32> to vector<8x1xf32>
    %90 = vector.broadcast %89 : vector<8x1xf32> to vector<8x8xf32>
    %91 = vector.broadcast %84 : vector<1x8xf32> to vector<8x8xf32>
    %92 = arith.mulf %90, %91 : vector<8x8xf32>
    %cst_12 = arith.constant -1.000000e+09 : f32
    %93 = vector.broadcast %cst_12 : f32 to vector<8x8xf32>
    %94 = arith.select %45, %92, %93 : vector<8x8xi1>, vector<8x8xf32>
    %cst_13 = arith.constant dense<0xFF800000> : vector<8xf32>
    %95 = vector.multi_reduction <maximumf>, %94, %cst_13 [1] : vector<8x8xf32> to vector<8xf32>
    %96 = vector.shape_cast %95 : vector<8xf32> to vector<8x1xf32>
    %97 = vector.broadcast %96 : vector<8x1xf32> to vector<8x8xf32>
    %98 = arith.subf %94, %97 : vector<8x8xf32>
    %99 = math.exp %98 : vector<8x8xf32>
    %cst_14 = arith.constant dense<0.000000e+00> : vector<8xf32>
    %100 = vector.multi_reduction <add>, %99, %cst_14 [1] : vector<8x8xf32> to vector<8xf32>
    %101 = vector.shape_cast %100 : vector<8xf32> to vector<8x1xf32>
    %102 = tpu.reciprocal %101 : vector<8x1xf32> -> vector<8x1xf32>
    %103 = vector.broadcast %102 : vector<8x1xf32> to vector<8x8xf32>
    %104 = arith.mulf %99, %103 : vector<8x8xf32>
    %105 = vector.broadcast %88 : vector<1x8xf32> to vector<8x8xf32>
    %106 = arith.mulf %104, %105 : vector<8x8xf32>
    %cst_15 = arith.constant dense<0.000000e+00> : vector<8xf32>
    %107 = vector.multi_reduction <add>, %106, %cst_15 [1] : vector<8x8xf32> to vector<8xf32>
    %108 = vector.shape_cast %107 : vector<8xf32> to vector<8x1xf32>
    %109 = vector.extract_strided_slice %4 {offsets = [10, 0], sizes = [1, 3], strides = [1, 1]} : vector<12x3xf32> to vector<1x3xf32>
    %110 = vector.broadcast %108 : vector<8x1xf32> to vector<8x3xf32>
    %111 = vector.broadcast %109 : vector<1x3xf32> to vector<8x3xf32>
    %112 = arith.mulf %110, %111 : vector<8x3xf32>
    %113 = arith.addf %80, %112 : vector<8x3xf32>
    %114 = vector.extract_strided_slice %42 {offsets = [2, 0], sizes = [1, 8], strides = [1, 1]} : vector<6x8xf32> to vector<1x8xf32>
    %115 = vector.extract_strided_slice %5 {offsets = [1, 2], sizes = [1, 1], strides = [1, 1]} : vector<4x3xf32> to vector<1x1xf32>
    %116 = vector.broadcast %115 : vector<1x1xf32> to vector<1x8xf32>
    %117 = arith.addf %114, %116 : vector<1x8xf32>
    %118 = vector.extract_strided_slice %42 {offsets = [5, 0], sizes = [1, 8], strides = [1, 1]} : vector<6x8xf32> to vector<1x8xf32>
    %119 = vector.extract_strided_slice %5 {offsets = [2, 2], sizes = [1, 1], strides = [1, 1]} : vector<4x3xf32> to vector<1x1xf32>
    %120 = vector.broadcast %119 : vector<1x1xf32> to vector<1x8xf32>
    %121 = arith.addf %118, %120 : vector<1x8xf32>
    %122 = vector.extract_strided_slice %25 {offsets = [0, 2], sizes = [8, 1], strides = [1, 1]} : vector<8x3xf32> to vector<8x1xf32>
    %123 = vector.broadcast %122 : vector<8x1xf32> to vector<8x8xf32>
    %124 = vector.broadcast %117 : vector<1x8xf32> to vector<8x8xf32>
    %125 = arith.mulf %123, %124 : vector<8x8xf32>
    %cst_16 = arith.constant -1.000000e+09 : f32
    %126 = vector.broadcast %cst_16 : f32 to vector<8x8xf32>
    %127 = arith.select %45, %125, %126 : vector<8x8xi1>, vector<8x8xf32>
    %cst_17 = arith.constant dense<0xFF800000> : vector<8xf32>
    %128 = vector.multi_reduction <maximumf>, %127, %cst_17 [1] : vector<8x8xf32> to vector<8xf32>
    %129 = vector.shape_cast %128 : vector<8xf32> to vector<8x1xf32>
    %130 = vector.broadcast %129 : vector<8x1xf32> to vector<8x8xf32>
    %131 = arith.subf %127, %130 : vector<8x8xf32>
    %132 = math.exp %131 : vector<8x8xf32>
    %cst_18 = arith.constant dense<0.000000e+00> : vector<8xf32>
    %133 = vector.multi_reduction <add>, %132, %cst_18 [1] : vector<8x8xf32> to vector<8xf32>
    %134 = vector.shape_cast %133 : vector<8xf32> to vector<8x1xf32>
    %135 = tpu.reciprocal %134 : vector<8x1xf32> -> vector<8x1xf32>
    %136 = vector.broadcast %135 : vector<8x1xf32> to vector<8x8xf32>
    %137 = arith.mulf %132, %136 : vector<8x8xf32>
    %138 = vector.broadcast %121 : vector<1x8xf32> to vector<8x8xf32>
    %139 = arith.mulf %137, %138 : vector<8x8xf32>
    %cst_19 = arith.constant dense<0.000000e+00> : vector<8xf32>
    %140 = vector.multi_reduction <add>, %139, %cst_19 [1] : vector<8x8xf32> to vector<8xf32>
    %141 = vector.shape_cast %140 : vector<8xf32> to vector<8x1xf32>
    %142 = vector.extract_strided_slice %4 {offsets = [11, 0], sizes = [1, 3], strides = [1, 1]} : vector<12x3xf32> to vector<1x3xf32>
    %143 = vector.broadcast %141 : vector<8x1xf32> to vector<8x3xf32>
    %144 = vector.broadcast %142 : vector<1x3xf32> to vector<8x3xf32>
    %145 = arith.mulf %143, %144 : vector<8x3xf32>
    %146 = arith.addf %113, %145 : vector<8x3xf32>
    %c0_20 = arith.constant 0 : index
    %c0_21 = arith.constant 0 : index
    %c0_22 = arith.constant 0 : index
    %147 = vector.load %arg5[%c0_20, %c0_21, %c0_22] : memref<1x8x3xf32, #tpu.memory_space<vmem>>, vector<1x8x3xf32>
    %148 = vector.shape_cast %147 : vector<1x8x3xf32> to vector<8x3xf32>
    %149 = vector.shape_cast %146 : vector<8x3xf32> to vector<1x8x3xf32>
    tpu.vector_store %arg5[%c0_20, %c0_21, %c0_22], %149 {strides = array<i32>} : memref<1x8x3xf32, #tpu.memory_space<vmem>>, vector<1x8x3xf32>,
    return
  }
  func.func @transform_0(%arg0: i32) -> (i32, i32, i32) {
    %c0_i32 = arith.constant 0 : i32
    %c0_i32_0 = arith.constant 0 : i32
    %c0_i32_1 = arith.constant 0 : i32
    return %arg0, %c0_i32, %c0_i32_0 : i32, i32, i32
  }
  func.func @transform_1(%arg0: i32) -> (i32, i32, i32) {
    %c0_i32 = arith.constant 0 : i32
    %c0_i32_0 = arith.constant 0 : i32
    %c0_i32_1 = arith.constant 0 : i32
    return %arg0, %c0_i32, %c0_i32_0 : i32, i32, i32
  }
  func.func @transform_2(%arg0: i32) -> (i32, i32) {
    %c0_i32 = arith.constant 0 : i32
    %c0_i32_0 = arith.constant 0 : i32
    %c0_i32_1 = arith.constant 0 : i32
    return %c0_i32, %c0_i32_0 : i32, i32
  }
  func.func @transform_3(%arg0: i32) -> (i32, i32) {
    %c0_i32 = arith.constant 0 : i32
    %c0_i32_0 = arith.constant 0 : i32
    %c0_i32_1 = arith.constant 0 : i32
    return %c0_i32, %c0_i32_0 : i32, i32
  }
  func.func @transform_4(%arg0: i32) -> (i32, i32, i32) {
    %c0_i32 = arith.constant 0 : i32
    %c0_i32_0 = arith.constant 0 : i32
    %c0_i32_1 = arith.constant 0 : i32
    return %arg0, %c0_i32, %c0_i32_0 : i32, i32, i32
  }
}

</mosaic_0001>

<bundles_post_ra>
// kernel: tpu_custom_call.1
= control target key start
LH: loop header
LB: loop body
LE: loop exit
PB: predicated region body
PF: predicated region fallthrough
CT: control target
= control target key end

     0   :  { %s593_s15 = smov 0   ;;  %s726_s0 = inlined_call_operand.vmem [shape: f32[2,8,3], index: 0, kind: input, shape index: {}]   ;;  %s727_s1 = inlined_call_operand.vmem [shape: f32[2,3,8], index: 1, kind: input, shape index: {}]   ;;  %s728_s2 = inlined_call_operand.vmem [shape: f32[12,3], index: 2, kind: input, shape index: {}]   ;;  %s729_s3 = inlined_call_operand.vmem [shape: f32[4,3], index: 3, kind: input, shape index: {}]   ;;  %s730_s4 = inlined_call_operand.vmem [shape: f32[2,8,3], index: 4, kind: output, shape index: {}]  }
   0x1 LB: > { %s509_s16 = sadd.s32 4294967295, %s563_s15   ;;  %p513_p0 = scmp.ge.s32.totalorder %s563_s15, 1  ;;  %s563_s15 = sphi %s593_s15, %s14_s15  }
   0x2   : > { %p170_p1 = scmp.lt.s32.totalorder %s563_s15, 3 }
   0x4   : > { %p171_p2 = pnand %p513_p0, %p170_p1 }
   0x5   : > { %p198_p3 = scmp.lt.s32.totalorder (!%p171_p2), %s509_s16, 1  ;;  %v565_v0 = vmov (!%p171_p2), 0   ;;  %v566_v1 = vmov (!%p171_p2), 2   ;;  %v212_v3 = vld [vmem:[%s728_s2] sm:$0xff] (!%p171_p2)  ;;  %v567_v4 = vmov (!%p171_p2), 1   ;;  %v220_v6 = vlaneseq (!%p171_p2) }
   0x6   : > { %174 = sbr.rel (%p171_p2) target bundleno = 804 (0x324), region = 36  ;;  %530 = vset.pattern.permute.xlu0 (!%p171_p2), %v565_v0  ;;  %532 = vset.pattern.permute.xlu1 (!%p171_p2), %v566_v1  ;;  %v619_v5 = vld [vmem:[%s729_s3] sm:$0xf] (!%p171_p2)  ;;  %vm324_vm1 = vcmask (!%p171_p2), 64512   ;;  %vm442_vm2 = vcmask (!%p171_p2), 23552  }
   0x7   : > { %v626_v7 = vshrl.u32 (!%p171_p2), %v220_v6, 7  ;;  %v301_v48 = vand.u32 (!%p171_p2), 127, %v220_v6 }
   0x9   : > { %v629_v8 = vsub.s32 (!%p171_p2), 0, %v626_v7  ;;  %v634_v10 = vsub.s32 (!%p171_p2), 1, %v626_v7  ;;  %v637_v11 = vsub.s32 (!%p171_p2), 2, %v626_v7  ;;  %v672_v44 = vsub.s32 (!%p171_p2), 3, %v626_v7 }
   0xa   : > { %v369_v46 = vsub.s32 (!%p171_p2), 4, %v626_v7  ;;  %v413_v54 = vsub.s32 (!%p171_p2), 5, %v626_v7  ;;  %vm302_vm0 = vcmp.ge.s32.totalorder (!%p171_p2), %v626_v7, %v301_v48 }
   0xb   : > { %v223_v9 = vrot.slane (!%p171_p2), %v212_v3, %v629_v8  ;;  %v228_v14 = vrot.slane (!%p171_p2), %v619_v5, %v629_v8  ;;  %v237_v16 = vrot.slane (!%p171_p2), %v212_v3, %v634_v10  ;;  %v247_v17 = vrot.slane (!%p171_p2), %v212_v3, %v637_v11 }
   0xd   : > { %s732_s16 = smov (!%p198_p3, %s509_s16), 1 }
   0xe   : > { %s514_s17 = sshll.u32 %s732_s16, 3  ;;  %s515_s25 = sshll.u32 %s732_s16, 2 }
   0xf   : > { %s201_s20 = scalar_lea.vmem %s726_s0, %s514_s17  ;;  %s205_s28 = scalar_lea.vmem %s727_s1, %s515_s25 }
  0x10   : > { %v210_v2 = vld [vmem:[%s201_s20] sm:$0xff]  ;;  %s209_s7 = scalar_lea.vmem %s730_s4, %s514_s17 }
  0x11   : > { %217 = vperm.xlu0 %530, %v210_v2   ;;  %241 = vperm.xlu1 %532, %v210_v2   ;;  %v211_v18 = vld [vmem:[%s205_s28] sm:$0x7] }
  0x12   : > { %v647_v20 = vrot.slane %v211_v18, %v629_v8  ;;  %v650_v25 = vrot.slane %v211_v18, %v634_v10  ;;  %v653_v26 = vrot.slane %v211_v18, %v637_v11  ;;  %v689_v18 = vld [vmem:[%s728_s2 + $0x8] sm:$0xf] }
  0x15   : > { %531 = vset.pattern.permute.xlu0 %v567_v4  ;;  %533 = vset.pattern.permute.xlu1 %v565_v0 }
  0x16   : > { %231 = vperm.xlu0 %531, %v210_v2   ;;  %252 = vperm.xlu1 %533, %v212_v3  }
  0x1a   : > { %534 = vset.pattern.permute.xlu1 %v567_v4  ;;  %535 = vset.pattern.permute.xlu0 %v566_v1 }
  0x1b   : > { %267 = vperm.xlu1 %534, %v212_v3   ;;  %283 = vperm.xlu0 %535, %v212_v3  }
  0x1f   : > { %536 = vset.pattern.permute.xlu1 %v565_v0  ;;  %399 = vperm.xlu0 %535, %v619_v5  }
  0x20   : > { %305 = vperm.xlu1 %536, %v619_v5  }
  0x23   : > { %539 = vset.pattern.permute.xlu0 %v567_v4 }
  0x24   : > { %537 = vset.pattern.permute.xlu1 %v567_v4 }
  0x25   : > { %355 = vperm.xlu1 %537, %v619_v5  }
  0x29   : > { %538 = vset.pattern.permute.xlu1 %v565_v0 }
  0x90   : > { %v218_v12 = vpop.permute.xlu0 %217  ;;  %v242_v13 = vpop.permute.xlu1 %241 }
  0x91   : > { %v224_v15 = vmul.f32 %v223_v9, %v218_v12  ;;  %v248_v24 = vmul.f32 %v247_v17, %v242_v13 }
  0x93   : > { %v229_v22 = vadd.f32 %v228_v14, %v224_v15 }
  0x95   : > { %v232_v19 = vpop.permute.xlu0 %231  ;;  %v253_v21 = vpop.permute.xlu1 %252 }
  0x96   : > { %v238_v23 = vmul.f32 %v237_v16, %v232_v19  ;;  %v264_v28 = vmul.f32 %v647_v20, %v253_v21 }
  0x98   : > { %v239_v27 = vadd.f32 %v238_v23, %v229_v22 }
  0x9a   : > { %v249_v29 = vadd.f32 %v248_v24, %v239_v27  ;;  %v268_v30 = vpop.permute.xlu1 %267  ;;  %v284_v31 = vpop.permute.xlu0 %283 }
  0x9b   : > { %v278_v32 = vmul.f32 %v650_v25, %v268_v30  ;;  %v294_v33 = vmul.f32 %v653_v26, %v284_v31  ;;  %v338_v30 = vsub.s32 6, %v626_v7  ;;  %v386_v31 = vsub.s32 7, %v626_v7 }
  0x9c   : > { %364 = vperm.xlu0 %539, %v249_v29   ;;  %315 = vperm.xlu1 %538, %v249_v29  }
  0x9d   : > { %v280_v34 = vadd.f32 %v278_v32, %v264_v28 }
  0x9e   : > { %v668_v42 = vpop.permute.xlu0 %399 }
  0x9f   : > { %v306_v35 = vpop.permute.xlu1 %305  ;;  %v658_v36 = vadd.f32 %v294_v33, %v280_v34  ;;  %v401_v47 = vrot.slane %v668_v42, 4 }
  0xa0   : > { %540 = vset.pattern.permute.xlu1 %v566_v1  ;;  %v310_v37 = vrot.slane %v306_v35, 4  ;;  %541 = vset.pattern.permute.xlu0 %v565_v0  ;;  %v307_v40 = vrot.slane %v306_v35, 6 }
  0xa1   : > { %408 = vperm.xlu1 %540, %v249_v29   ;;  %v403_v51 = vadd.f32 %v401_v47, %v658_v36 }
  0xa2   : > { %v663_v38 = vadd.f32 %v310_v37, %v658_v36  ;;  %v309_v45 = vadd.f32 %v307_v40, %v658_v36 }
  0xa3   : > { %v414_v59 = vrot.slane %v403_v51, %v413_v54  ;;  %v404_v51 = vrot.slane %v668_v42, 2  ;;  %v395_v42 = vrot.slane %v689_v18, %v637_v11 }
  0xa4   : > { %v665_v39 = vpop.permute.xlu1 %355  ;;  %v321_v49 = vrot.slane %v309_v45, %v672_v44  ;;  %v339_v35 = vrot.slane %v663_v38, %v338_v30 }
  0xa5   : > { %542 = vset.pattern.permute.xlu1 %v567_v4  ;;  %v357_v41 = vrot.slane %v665_v39, 5  ;;  %v360_v29 = vrot.slane %v665_v39, 3 }
  0xa7   : > { %v359_v43 = vadd.f32 %v357_v41, %v658_v36 }
  0xa9   : > { %v370_v50 = vrot.slane %v359_v43, %v369_v46 }
 0x11b   : > { %v316_v52 = vpop.permute.xlu1 %315  ;;  %v365_v53 = vpop.permute.xlu0 %364 }
 0x11c   : > { %v322_v55 = vmul.f32 %v321_v49, %v316_v52  ;;  %v371_v56 = vmul.f32 %v370_v50, %v365_v53 }
 0x11e   : > { %v323_v57 = vsel %vm302_vm0, %v322_v55, -1e+09  ;;  %v372_v58 = vsel %vm302_vm0, %v371_v56, -1e+09 }
 0x11f   : > { %v325_v60 = vsel %vm324_vm1, %v323_v57, -inf  ;;  %v373_v61 = vsel %vm324_vm1, %v372_v58, -inf }
 0x120   : > { %v409_v62 = vpop.permute.xlu1 %408  ;;  %326 = vmax.xlane.f32.xlu1 %v325_v60  ;;  %374 = vmax.xlane.f32.xlu0 %v373_v61 }
 0x121   : > { %v415_v63 = vmul.f32 %v414_v59, %v409_v62 }
 0x123   : > { %v416_v0 = vsel %vm302_vm0, %v415_v63, -1e+09 }
 0x124   : > { %v417_v2 = vsel %vm324_vm1, %v416_v0, -inf }
 0x125   : > { %418 = vmax.xlane.f32.xlu0 %v417_v2 }
 0x1ad   : > { %v327_v3 = vpop.xlane.xlu1 %326  ;;  %v375_v4 = vpop.xlane.xlu0 %374 }
 0x1ae   : > { %v328_v6 = vsub.f32 %v323_v57, %v327_v3  ;;  %v376_v9 = vsub.f32 %v372_v58, %v375_v4 }
 0x1b0   : > { %v329_v12 = vmul.f32 1.442695, %v328_v6  ;;  %v377_v13 = vmul.f32 1.442695, %v376_v9 }
 0x1b2   : > { %545 = vpow2.f32 %v329_v12  ;;  %v419_v19 = vpop.xlane.xlu0 %418 }
 0x1b3   : > { %547 = vpow2.f32 %v377_v13  ;;  %v420_v21 = vsub.f32 %v416_v0, %v419_v19 }
 0x1b5   : > { %v421_v22 = vmul.f32 1.442695, %v420_v21 }
 0x1b7   : > { %549 = vpow2.f32 %v421_v22 }
 0x1bc   : > { %v546_v14 = vpop.eup %545 }
 0x1bd   : > { %v548_v15 = vpop.eup %547  ;;  %v331_v16 = vsel %vm324_vm1, %v546_v14, 0.0 }
 0x1be   : > { %332 = vadd.xlane.f32.xlu1 %v331_v16  ;;  %v379_v17 = vsel %vm324_vm1, %v548_v15, 0.0 }
 0x1bf   : > { %380 = vadd.xlane.f32.xlu0 %v379_v17 }
 0x1c1   : > { %v550_v23 = vpop.eup %549 }
 0x1c2   : > { %v423_v24 = vsel %vm324_vm1, %v550_v23, 0.0 }
 0x1cf   : > { %271 = vperm.xlu1 %542, %v689_v18  }
 0x1d3   : > { %543 = vset.pattern.permute.xlu1 %v566_v1 }
 0x1d5   : > { %257 = vperm.xlu0 %541, %v689_v18  }
 0x1d9   : > { %544 = vset.pattern.permute.xlu0 %v566_v1  ;;  %v362_v1 = vadd.f32 %v360_v29, %v658_v36 }
 0x1db   : > { %v387_v40 = vrot.slane %v362_v1, %v386_v31 }
 0x1f3   : > { %424 = vadd.xlane.f32.xlu1 %v423_v24 }
 0x204   : > { %287 = vperm.xlu1 %543, %v689_v18  }
 0x24b   : > { %v333_v27 = vpop.xlane.xlu1 %332 }
 0x24c   : > { %551 = vrcp.f32 %v333_v27  ;;  %v381_v28 = vpop.xlane.xlu0 %380 }
 0x24d   : > { %553 = vrcp.f32 %v381_v28 }
 0x24f   : > { %v272_v46 = vpop.permute.xlu1 %271 }
 0x250   : > { %v279_v48 = vmul.f32 %v650_v25, %v272_v46 }
 0x254   : > { %v258_v47 = vpop.permute.xlu0 %257 }
 0x255   : > { %v265_v7 = vmul.f32 %v647_v20, %v258_v47  ;;  %v347_v20 = vrot.slane %v689_v18, %v634_v10 }
 0x256   : > { %v552_v32 = vpop.eup %551 }
 0x257   : > { %v554_v33 = vpop.eup %553  ;;  %v335_v34 = vmul.f32 %v552_v32, %v546_v14  ;;  %v281_v38 = vadd.f32 %v279_v48, %v265_v7 }
 0x258   : > { %v383_v37 = vmul.f32 %v554_v33, %v548_v15 }
 0x259   : > { %v340_v41 = vmul.f32 %v339_v35, %v335_v34 }
 0x25a   : > { %v388_v43 = vmul.f32 %v387_v40, %v383_v37 }
 0x25b   : > { %v341_v45 = vsel %vm324_vm1, %v340_v41, 0.0 }
 0x25c   : > { %342 = vadd.xlane.f32.xlu1 %v341_v45  ;;  %v389_v39 = vsel %vm324_vm1, %v388_v43, 0.0 }
 0x25d   : > { %390 = vadd.xlane.f32.xlu0 %v389_v39 }
 0x280   : > { %v425_v36 = vpop.xlane.xlu1 %424 }
 0x281   : > { %555 = vrcp.f32 %v425_v36 }
 0x284   : > { %v288_v49 = vpop.permute.xlu1 %287 }
 0x285   : > { %v295_v50 = vmul.f32 %v653_v26, %v288_v49  ;;  %v352_v26 = vrot.slane %v619_v5, %v672_v44 }
 0x287   : > { %v297_v52 = vadd.f32 %v295_v50, %v281_v38 }
 0x289   : > { %v406_v53 = vadd.f32 %v404_v51, %v297_v52 }
 0x28b   : > { %v556_v54 = vpop.eup %555  ;;  %v431_v55 = vrot.slane %v406_v53, %v629_v8  ;;  %v439_v8 = vrot.slane %v689_v18, %v672_v44 }
 0x28c   : > { %v427_v56 = vmul.f32 %v556_v54, %v550_v23 }
 0x28e   : > { %v432_v57 = vmul.f32 %v431_v55, %v427_v56 }
 0x290   : > { %v433_v58 = vsel %vm324_vm1, %v432_v57, 0.0 }
 0x291   : > { %434 = vadd.xlane.f32.xlu1 %v433_v58 }
 0x2e9   : > { %v343_v25 = vpop.xlane.xlu1 %342 }
 0x2ea   : > { %v348_v59 = vmul.f32 %v347_v20, %v343_v25  ;;  %v391_v60 = vpop.xlane.xlu0 %390 }
 0x2eb   : > { %v396_v62 = vmul.f32 %v395_v42, %v391_v60 }
 0x2ec   : > { %v353_v61 = vadd.f32 %v352_v26, %v348_v59 }
 0x2ee   : > { %v397_v0 = vadd.f32 %v396_v62, %v353_v61 }
 0x31e   : > { %v435_v63 = vpop.xlane.xlu1 %434 }
 0x31f   : > { %v440_v2 = vmul.f32 %v439_v8, %v435_v63 }
 0x321   : > { %v441_v5 = vadd.f32 %v440_v2, %v397_v0 }
 0x323   : > { %443 = vst.msk [vmem:[%s209_s7] sm:$0xff] %vm442_vm2, %v441_v5 }
 0x324 PF: > { %s14_s15 = sadd.s32 1, %s563_s15  }
 0x325   : > { %p11_p4 = scmp.ge.s32.totalorder %s14_s15, 4  }
 0x327   :  { %13 = sbr.rel (!%p11_p4) target bundleno = 1 (0x1), region = 69 }

</bundles_post_ra>
